<compile_context>
chip_gen: v7x
topology: tpu7x:2x2x1
jax: 0.10.0
libtpu: 0.0.40
codegen_flags: <defaults>
</compile_context>

<pallas_src>
import functools
import math

import jax
import jax.numpy as jnp
from jax.experimental import pallas as pl
from jax.experimental.pallas import tpu as pltpu

# Whole-array VMEM block (block_shape=None => full array), no grid.
_VMEM = pl.BlockSpec(memory_space=pltpu.MemorySpace.VMEM)


# --------------------------------------------------------------------------
# Small helpers shared by kernels
# --------------------------------------------------------------------------
def _ln_f32(x, g, b, eps):
    mu = jnp.mean(x, axis=-1, keepdims=True)
    xc = x - mu
    var = jnp.mean(xc * xc, axis=-1, keepdims=True)
    return xc * jax.lax.rsqrt(var + eps) * g + b


# --------------------------------------------------------------------------
# Embedding LayerNorm (stand-alone; embeddings themselves are a JAX gather)
# --------------------------------------------------------------------------
def _layernorm_kernel(x_ref, g_ref, b_ref, o_ref, *, eps):
    x = x_ref[...].astype(jnp.float32)
    o_ref[...] = _ln_f32(x, g_ref[...], b_ref[...], eps).astype(o_ref.dtype)


def layer_norm(x, g, b, eps=1e-12):
    n = x.shape[-1]
    return pl.pallas_call(
        functools.partial(_layernorm_kernel, eps=eps),
        out_shape=jax.ShapeDtypeStruct(x.shape, x.dtype),
        in_specs=[_VMEM, _VMEM, _VMEM],
        out_specs=_VMEM,
    )(x, g.reshape(1, n), b.reshape(1, n))


# --------------------------------------------------------------------------
# Fused transformer encoder layer (QKV + attention + proj + LN + FFN + LN)
# --------------------------------------------------------------------------
def _encoder_layer_kernel(x_ref, mask_ref, wqkv_ref, bqkv_ref, wo_ref, bo_ref,
                          ln1g_ref, ln1b_ref, w1_ref, b1_ref, w2_ref, b2_ref,
                          ln2g_ref, ln2b_ref, o_ref, qkv_s, ctx_s,
                          *, batch, seq, heads, head_dim, scale, eps):
    hidden = x_ref.shape[1]
    m = x_ref.shape[0]
    x = x_ref[...].astype(jnp.float32)

    # Fused QKV projection: one MXU pass, staged in VMEM scratch.
    qkv_s[...] = (jnp.dot(x, wqkv_ref[...], preferred_element_type=jnp.float32)
                  + bqkv_ref[...])

    # Additive attention mask built in-kernel from the (batch, seq) 0/1 mask
    # (no O(B*heads*S^2) HBM tensor is ever materialized).
    add_mask = (1.0 - mask_ref[...].astype(jnp.float32)) * -1e9
    add_mask = add_mask[:, None, :]                          # (batch, 1, seq)

    # Per-head attention; head split/merge done via lane slices of the
    # VMEM scratch (no HBM transposes between kernels).
    for h in range(heads):
        lo = h * head_dim
        q = qkv_s[:, lo:lo + head_dim].reshape(batch, seq, head_dim)
        k = qkv_s[:, hidden + lo:hidden + lo + head_dim].reshape(batch, seq, head_dim)
        v = qkv_s[:, 2 * hidden + lo:2 * hidden + lo + head_dim].reshape(
            batch, seq, head_dim)
        s = jnp.einsum("bqd,bkd->bqk", q, k,
                       preferred_element_type=jnp.float32) * scale + add_mask
        s = s - jnp.max(s, axis=-1, keepdims=True)
        p = jnp.exp(s)
        # Softmax denominator on the EUP slot (approx reciprocal is free-ish).
        p = p * pl.reciprocal(jnp.sum(p, axis=-1, keepdims=True), approx=True)
        ctx_h = jnp.einsum("bqk,bkd->bqd", p, v,
                           preferred_element_type=jnp.float32)
        ctx_s[:, lo:lo + head_dim] = ctx_h.reshape(m, head_dim)

    # Output projection + residual + LayerNorm (fused epilogue).
    attn_out = (jnp.dot(ctx_s[...], wo_ref[...],
                        preferred_element_type=jnp.float32) + bo_ref[...])
    x = _ln_f32(x + attn_out, ln1g_ref[...], ln1b_ref[...], eps)

    # FFN + residual + LayerNorm (fused).
    ff = jnp.dot(x, w1_ref[...], preferred_element_type=jnp.float32) + b1_ref[...]
    # TODO(synk): HF BERT/RoBERTa uses exact-erf GELU; tanh approximation used here.
    ff = jax.nn.gelu(ff, approximate=True)
    ff = jnp.dot(ff, w2_ref[...], preferred_element_type=jnp.float32) + b2_ref[...]
    x = _ln_f32(x + ff, ln2g_ref[...], ln2b_ref[...], eps)

    o_ref[...] = x.astype(o_ref.dtype)


def encoder_layer(x, mask_f32, layer, cfg):
    m, hidden = x.shape
    batch, seq = mask_f32.shape
    heads = cfg["heads"]
    head_dim = hidden // heads
    scale = 1.0 / math.sqrt(head_dim)
    return pl.pallas_call(
        functools.partial(_encoder_layer_kernel, batch=batch, seq=seq,
                          heads=heads, head_dim=head_dim, scale=scale, eps=1e-12),
        out_shape=jax.ShapeDtypeStruct((m, hidden), x.dtype),
        in_specs=[_VMEM] * 14,
        out_specs=_VMEM,
        scratch_shapes=[pltpu.VMEM((m, 3 * hidden), jnp.float32),
                        pltpu.VMEM((m, hidden), jnp.float32)],
    )(x, mask_f32,
      layer["wqkv"], layer["bqkv"].reshape(1, -1),
      layer["wo"], layer["bo"].reshape(1, -1),
      layer["ln1_g"].reshape(1, -1), layer["ln1_b"].reshape(1, -1),
      layer["w1"], layer["b1"].reshape(1, -1),
      layer["w2"], layer["b2"].reshape(1, -1),
      layer["ln2_g"].reshape(1, -1), layer["ln2_b"].reshape(1, -1))


# --------------------------------------------------------------------------
# Bidirectional LSTM over an unbatched length-B sequence (PyTorch 2-D LSTM)
# --------------------------------------------------------------------------
def _bilstm_kernel(x_ref, wih_f_ref, whh_f_ref, b_f_ref,
                   wih_b_ref, whh_b_ref, b_b_ref, o_ref,
                   gih_f, gih_b, fwd_s, bwd_s, *, hidden, seq_len):
    x = x_ref[...].astype(jnp.float32)
    # Hoisted: input-to-hidden projections for ALL timesteps, one well-shaped
    # matmul per direction (the recurrence only carries h @ Whh).
    gih_f[...] = (jnp.dot(x, wih_f_ref[...], preferred_element_type=jnp.float32)
                  + b_f_ref[...])
    gih_b[...] = (jnp.dot(x, wih_b_ref[...], preferred_element_type=jnp.float32)
                  + b_b_ref[...])
    whh_f = whh_f_ref[...]
    whh_b = whh_b_ref[...]

    # PyTorch LSTM cell, gate order i, f, g, o (b_ih + b_hh folded into bias).
    def cell(gates_pre, h, c, whh):
        gates = gates_pre + jnp.dot(h, whh, preferred_element_type=jnp.float32)
        i = jax.nn.sigmoid(gates[:, 0 * hidden:1 * hidden])
        f = jax.nn.sigmoid(gates[:, 1 * hidden:2 * hidden])
        g = jnp.tanh(gates[:, 2 * hidden:3 * hidden])
        o = jax.nn.sigmoid(gates[:, 3 * hidden:4 * hidden])
        c_new = f * c + i * g
        h_new = o * jnp.tanh(c_new)
        return h_new, c_new

    def fwd_body(t, carry):
        h, c = carry
        h, c = cell(gih_f[pl.ds(t, 1), :], h, c, whh_f)
        fwd_s[pl.ds(t, 1), :] = h
        return (h, c)

    def bwd_body(s, carry):
        h, c = carry
        t = seq_len - 1 - s
        h, c = cell(gih_b[pl.ds(t, 1), :], h, c, whh_b)
        bwd_s[pl.ds(t, 1), :] = h
        return (h, c)

    init = (jnp.zeros((1, hidden), jnp.float32),
            jnp.zeros((1, hidden), jnp.float32))
    jax.lax.fori_loop(0, seq_len, fwd_body, init, unroll=True)
    jax.lax.fori_loop(0, seq_len, bwd_body, init, unroll=True)
    o_ref[:, :hidden] = fwd_s[...].astype(o_ref.dtype)
    o_ref[:, hidden:] = bwd_s[...].astype(o_ref.dtype)


def bilstm(x, wih_f, whh_f, b_f, wih_b, whh_b, b_b, hidden):
    seq_len = x.shape[0]
    return pl.pallas_call(
        functools.partial(_bilstm_kernel, hidden=hidden, seq_len=seq_len),
        out_shape=jax.ShapeDtypeStruct((seq_len, 2 * hidden), x.dtype),
        in_specs=[_VMEM] * 7,
        out_specs=_VMEM,
        scratch_shapes=[pltpu.VMEM((seq_len, 4 * hidden), jnp.float32),
                        pltpu.VMEM((seq_len, 4 * hidden), jnp.float32),
                        pltpu.VMEM((seq_len, hidden), jnp.float32),
                        pltpu.VMEM((seq_len, hidden), jnp.float32)],
    )(x, wih_f, whh_f, b_f.reshape(1, -1),
      wih_b, whh_b, b_b.reshape(1, -1))


# --------------------------------------------------------------------------
# Fused classification head: Linear -> ReLU -> Linear (+ L2-normalized copy)
# --------------------------------------------------------------------------
def _mlp_head_kernel(x_ref, w1_ref, b1_ref, w2_ref, b2_ref,
                     out_ref, feat_ref, *, eps):
    x = x_ref[...].astype(jnp.float32)
    h = jnp.dot(x, w1_ref[...], preferred_element_type=jnp.float32) + b1_ref[...]
    h = jnp.maximum(h, 0.0)
    y = jnp.dot(h, w2_ref[...], preferred_element_type=jnp.float32) + b2_ref[...]
    out_ref[...] = y.astype(out_ref.dtype)
    nrm = jnp.sqrt(jnp.sum(y * y, axis=-1, keepdims=True))
    feat_ref[...] = (y / jnp.maximum(nrm, eps)).astype(feat_ref.dtype)


def mlp_head(x, w1, b1, w2, b2, eps=1e-12):
    m = x.shape[0]
    n = w2.shape[1]
    return pl.pallas_call(
        functools.partial(_mlp_head_kernel, eps=eps),
        out_shape=(jax.ShapeDtypeStruct((m, n), x.dtype),
                   jax.ShapeDtypeStruct((m, n), x.dtype)),
        in_specs=[_VMEM] * 5,
        out_specs=(_VMEM, _VMEM),
    )(x, w1, b1.reshape(1, -1), w2, b2.reshape(1, -1))


# --------------------------------------------------------------------------
# Synthetic BERT encoder (glue: gathers / reshapes; compute in Pallas kernels)
# --------------------------------------------------------------------------
def bert_encoder(p, input_ids, token_type_ids, attention_mask, cfg):
    B, S = input_ids.shape
    H = cfg["hidden"]
    # TODO(synk): embedding-table gather kept in plain JAX (no clean Pallas gather here).
    emb = (p["word_emb"][input_ids]
           + p["pos_emb"][jnp.arange(S)][None, :, :]
           + p["type_emb"][token_type_ids])
    x = layer_norm(emb.reshape(B * S, H), p["emb_ln_g"], p["emb_ln_b"])
    mask_f32 = attention_mask.astype(jnp.float32)
    for layer in p["layers"]:
        x = encoder_layer(x, mask_f32, layer, cfg)
    return x.reshape(B, S, H)


# --------------------------------------------------------------------------
# stance_classifier forward
# --------------------------------------------------------------------------
def stance_classifier_forward(params, x_input_ids, x_seg_ids, x_atten_masks,
                              x_len, x_input_ids2, cfg):
    # x_len is unused in the reference forward (kept for signature parity).
    del x_len
    B = x_input_ids.shape[0]
    H = cfg["hidden"]

    # Both encoder passes share weights / mask / segment ids -> batch them into
    # one 2B pass (halves launches, doubles matmul M).
    ids = jnp.concatenate([x_input_ids, x_input_ids2], axis=0)
    seg = jnp.concatenate([x_seg_ids, x_seg_ids], axis=0)
    msk = jnp.concatenate([x_atten_masks, x_atten_masks], axis=0)
    h = bert_encoder(params["bert"], ids, seg, msk, cfg)       # (2B, S, H)

    query = h[:B, 0]     # (B, H)  CLS hidden state, pass 1
    query2 = h[B:, 0]    # (B, H)  CLS hidden state, pass 2
    # nn.Dropout: identity at inference time.

    context_vec = jnp.concatenate([query, query2], axis=1)     # (B, 2H)
    # PyTorch nn.LSTM on a 2-D input treats it as an UNBATCHED sequence of
    # length B -> out1 has shape (B, 2H) (bidirectional, hidden=H).
    out1 = bilstm(context_vec,
                  params["lstm_wih_f"], params["lstm_whh_f"], params["lstm_b_f"],
                  params["lstm_wih_b"], params["lstm_whh_b"], params["lstm_b_b"],
                  H)

    out, _ = mlp_head(query, params["lin_w"], params["lin_b"],
                      params["out_w"], params["out_b"])         # (B, num_labels)
    out2, feat = mlp_head(out1, params["lin2_w"], params["lin2_b"],
                          params["out2_w"], params["out2_b"])   # (B, 2), (B, 2)

    feature1 = feat[:, None, :]                                 # (B, 1, 2)
    feature2 = feat[:, None, :]                                 # (B, 1, 2)
    return out, out2, feature1, feature2


# --------------------------------------------------------------------------
# Deterministic parameter init (synthetic, in-script)
# --------------------------------------------------------------------------
def init_params(key, cfg, num_labels):
    H, I = cfg["hidden"], cfg["intermediate"]
    keys = iter(jax.random.split(key, 64))

    def w(shape, scale=0.02):
        return scale * jax.random.normal(next(keys), shape, jnp.float32)

    bert = {
        "word_emb": w((cfg["vocab"], H)),
        "pos_emb": w((cfg["max_pos"], H)),
        "type_emb": w((cfg["type_vocab"], H)),
        "emb_ln_g": jnp.ones((H,), jnp.float32),
        "emb_ln_b": jnp.zeros((H,), jnp.float32),
        "layers": [],
    }
    for _ in range(cfg["layers"]):
        bert["layers"].append({
            # Fused QKV weight [H, 3H] (Q | K | V column blocks) and bias.
            "wqkv": w((H, 3 * H)), "bqkv": jnp.zeros((3 * H,), jnp.float32),
            "wo": w((H, H)), "bo": jnp.zeros((H,), jnp.float32),
            "ln1_g": jnp.ones((H,), jnp.float32), "ln1_b": jnp.zeros((H,), jnp.float32),
            "w1": w((H, I)), "b1": jnp.zeros((I,), jnp.float32),
            "w2": w((I, H)), "b2": jnp.zeros((H,), jnp.float32),
            "ln2_g": jnp.ones((H,), jnp.float32), "ln2_b": jnp.zeros((H,), jnp.float32),
        })

    return {
        "bert": bert,
        "lin_w": w((H, H)), "lin_b": jnp.zeros((H,), jnp.float32),
        "lin2_w": w((2 * H, H)), "lin2_b": jnp.zeros((H,), jnp.float32),
        "out_w": w((H, num_labels)), "out_b": jnp.zeros((num_labels,), jnp.float32),
        "out2_w": w((H, 2)), "out2_b": jnp.zeros((2,), jnp.float32),
        "lstm_wih_f": w((2 * H, 4 * H), 0.1), "lstm_whh_f": w((H, 4 * H), 0.1),
        "lstm_b_f": w((4 * H,), 0.1),
        "lstm_wih_b": w((2 * H, 4 * H), 0.1), "lstm_whh_b": w((H, 4 * H), 0.1),
        "lstm_b_b": w((4 * H,), 0.1),
    }


if __name__ == "__main__":
    cfg = dict(hidden=32, heads=4, intermediate=64, layers=2,
               vocab=100, type_vocab=2, max_pos=16)
    num_labels = 3
    B, S = 2, 8

    key = jax.random.PRNGKey(0)
    pkey, k1, k2 = jax.random.split(key, 3)
    params = init_params(pkey, cfg, num_labels)

    x_input_ids = jax.random.randint(k1, (B, S), 0, cfg["vocab"], dtype=jnp.int32)
    x_input_ids2 = jax.random.randint(k2, (B, S), 0, cfg["vocab"], dtype=jnp.int32)
    x_seg_ids = jnp.zeros((B, S), jnp.int32).at[:, S // 2:].set(1)
    x_atten_masks = jnp.ones((B, S), jnp.int32).at[1, -2:].set(0)
    x_len = jnp.array([S, S - 2], jnp.int32)

    out, out2, feature1, feature2 = stance_classifier_forward(
        params, x_input_ids, x_seg_ids, x_atten_masks, x_len, x_input_ids2, cfg)
    jax.block_until_ready((out, out2, feature1, feature2))

    assert out.shape == (B, num_labels)
    assert out2.shape == (B, 2)
    assert feature1.shape == (B, 1, 2) and feature2.shape == (B, 1, 2)
    print("KERNEL_OK")
</pallas_src>

<mosaic_0001>
module attributes {stable_mosaic.version = 11 : i64} {
  func.func @_layernorm_kernel(%arg0: memref<32x32xf32, #tpu.memory_space<vmem>>, %arg1: memref<1x32xf32, #tpu.memory_space<vmem>>, %arg2: memref<1x32xf32, #tpu.memory_space<vmem>>, %arg3: memref<32x32xf32, #tpu.memory_space<vmem>>) attributes {dimension_semantics = [], scalar_prefetch = 0 : i64, scratch_operands = 0 : i64, tpu.core_type = #tpu.core_type<tc>} {
    %c0 = arith.constant 0 : index
    %c0_0 = arith.constant 0 : index
    %0 = vector.load %arg0[%c0, %c0_0] : memref<32x32xf32, #tpu.memory_space<vmem>>, vector<32x32xf32>
    %c0_1 = arith.constant 0 : index
    %c0_2 = arith.constant 0 : index
    %1 = vector.load %arg1[%c0_1, %c0_2] : memref<1x32xf32, #tpu.memory_space<vmem>>, vector<1x32xf32>
    %c0_3 = arith.constant 0 : index
    %c0_4 = arith.constant 0 : index
    %2 = vector.load %arg2[%c0_3, %c0_4] : memref<1x32xf32, #tpu.memory_space<vmem>>, vector<1x32xf32>
    %cst = arith.constant dense<0.000000e+00> : vector<32xf32>
    %3 = vector.multi_reduction <add>, %0, %cst [1] : vector<32x32xf32> to vector<32xf32>
    %4 = vector.shape_cast %3 : vector<32xf32> to vector<32x1xf32>
    %cst_5 = arith.constant 3.200000e+01 : f32
    %5 = vector.broadcast %cst_5 : f32 to vector<32x1xf32>
    %6 = arith.divf %4, %5 : vector<32x1xf32>
    %7 = vector.broadcast %6 : vector<32x1xf32> to vector<32x32xf32>
    %8 = arith.subf %0, %7 : vector<32x32xf32>
    %9 = arith.mulf %8, %8 : vector<32x32xf32>
    %cst_6 = arith.constant dense<0.000000e+00> : vector<32xf32>
    %10 = vector.multi_reduction <add>, %9, %cst_6 [1] : vector<32x32xf32> to vector<32xf32>
    %11 = vector.shape_cast %10 : vector<32xf32> to vector<32x1xf32>
    %cst_7 = arith.constant 3.200000e+01 : f32
    %12 = vector.broadcast %cst_7 : f32 to vector<32x1xf32>
    %13 = arith.divf %11, %12 : vector<32x1xf32>
    %cst_8 = arith.constant 9.99999996E-13 : f32
    %14 = vector.broadcast %cst_8 : f32 to vector<32x1xf32>
    %15 = arith.addf %13, %14 : vector<32x1xf32>
    %16 = math.rsqrt %15 : vector<32x1xf32>
    %17 = vector.broadcast %16 : vector<32x1xf32> to vector<32x32xf32>
    %18 = arith.mulf %8, %17 : vector<32x32xf32>
    %19 = vector.broadcast %1 : vector<1x32xf32> to vector<32x32xf32>
    %20 = arith.mulf %18, %19 : vector<32x32xf32>
    %21 = vector.broadcast %2 : vector<1x32xf32> to vector<32x32xf32>
    %22 = arith.addf %20, %21 : vector<32x32xf32>
    %c0_9 = arith.constant 0 : index
    %c0_10 = arith.constant 0 : index
    %23 = vector.load %arg3[%c0_9, %c0_10] : memref<32x32xf32, #tpu.memory_space<vmem>>, vector<32x32xf32>
    tpu.vector_store %arg3[%c0_9, %c0_10], %22 {strides = array<i32>} : memref<32x32xf32, #tpu.memory_space<vmem>>, vector<32x32xf32>,
    return
  }
}

</mosaic_0001>

<bundles_post_ra>
// kernel: tpu_custom_call.1
= control target key start
LH: loop header
LB: loop body
LE: loop exit
PB: predicated region body
PF: predicated region fallthrough
CT: control target
= control target key end

     0   :  { %8 = vsyncpa [#allocation3], 0  ;;  %s264_s0 = inlined_call_operand.hbm [shape: f32[32,32], index: 0, kind: input, shape index: {}]   ;;  %s265_s1 = inlined_call_operand.vmem [shape: f32[1,32], index: 1, kind: input, shape index: {}]   ;;  %s266_s2 = inlined_call_operand.vmem [shape: f32[1,32], index: 2, kind: input, shape index: {}]   ;;  %s267_s3 = inlined_call_operand.hbm [shape: f32[32,32], index: 3, kind: output, shape index: {}]  }
   0x1   :  { %9 = vsyncpa [#allocation4], 0  ;;  %s192_s12 = smov [#allocation2]   ;;  %s144_s16 = scalar_lea.hbm %s264_s0, 512 }
   0x2   :  { %s15_s13 = sshll.u32 %s192_s12, 4  ;;  %p145_p0 = scmp.ne.s32.totalorder %s264_s0, %s144_s16  ;;  %s16_s13 = int_to_ptr.vmem [resolvable:$true] %s15_s13 }
   0x3   :  { %p148_p1 = scmp.lt.u32.totalorder %s144_s16, %s264_s0 }
   0x5   :  { %p150_p2 = pnand %p148_p1, %p145_p0 }
   0x7   :  { %153 = shalt.err (!%p150_p2)
}
   0x8   :  { %s154_s21 = scalar_lea.vmem %s16_s13, 512  ;;  %p159_p4 = scmp.lt.s32.totalorder %s16_s13, %s16_s13 }
   0x9   :  { %p155_p3 = scmp.ne.s32.totalorder %s16_s13, %s154_s21  ;;  %p160_p5 = scmp.lt.s32.totalorder %s154_s21, %s154_s21 }
   0xb   :  { %p161_p6 = por %p160_p5, %p159_p4 }
   0xd   :  { %p162_p7 = pnand %p161_p6, %p155_p3 }
   0xf   :  { %165 = shalt.err (!%p162_p7)
}
  0x10   :  { %s193_s22 = smov 128   ;;  %s194_s23 = smov 8  }
  0x11   :  { %21 = dma.hbm_to_vmem [thread:$0]  %s264_s0, 512, %s16_s13, [#allocation3], %s193_s22, %s193_s22, %s194_s23  }
  0x12   :  { %188 = dma.done.wait [#allocation3], 512  }
  0x13   :  { %189 = vsyncadd [#allocation3], 4294966784  ;;  %vm35_vm0 = vcmask 261120   ;;  %v29_v0 = vld [vmem:[#allocation2] sm:$0xff]  ;;  %v31_v1 = vld [vmem:[#allocation2 + $0x10] sm:$0xff] }
  0x14   :  { %v30_v2 = vld [vmem:[#allocation2 + $0x8] sm:$0xff]  ;;  %v36_v3 = vsel %vm35_vm0, %v29_v0, 0.0  ;;  %v42_v4 = vsel %vm35_vm0, %v31_v1, 0.0  ;;  %v32_v5 = vld [vmem:[#allocation2 + $0x18] sm:$0xff]  ;;  %v130_v41 = vld [vmem:[%s265_s1] ss:$0 sm:$0xff] }
  0x15   :  { %37 = vadd.xlane.f32.xlu0 %v36_v3  ;;  %43 = vadd.xlane.f32.xlu1 %v42_v4  ;;  %v39_v6 = vsel %vm35_vm0, %v30_v2, 0.0  ;;  %v45_v7 = vsel %vm35_vm0, %v32_v5, 0.0  ;;  %v131_v43 = vld [vmem:[%s266_s2] ss:$0 sm:$0xff]  ;;  %s195_s1 = smov [#allocation5]  }
  0x16   :  { %s118_s29 = sshll.u32 %s195_s1, 4  ;;  %s119_s29 = int_to_ptr.vmem [resolvable:$true] %s118_s29 }
  0x17   :  { %s166_s2 = scalar_lea.vmem %s119_s29, 512  ;;  %p171_p9 = scmp.lt.s32.totalorder %s119_s29, %s119_s29 }
  0x18   :  { %p167_p8 = scmp.ne.s32.totalorder %s119_s29, %s166_s2  ;;  %p172_p10 = scmp.lt.s32.totalorder %s166_s2, %s166_s2 }
  0x19   :  { %40 = vadd.xlane.f32.xlu0 %v39_v6  ;;  %46 = vadd.xlane.f32.xlu1 %v45_v7 }
  0x1a   :  { %p173_p11 = por %p172_p10, %p171_p9 }
  0x1c   :  { %p174_p12 = pnand %p173_p11, %p167_p8 }
  0xa2   :  { %v38_v8 = vpop.xlane.xlu0 %37  ;;  %v44_v9 = vpop.xlane.xlu1 %43 }
  0xa3   :  { %v49_v10 = vmul.f32 0.03125, %v38_v8  ;;  %v51_v11 = vmul.f32 0.03125, %v44_v9 }
  0xa5   :  { %v53_v12 = vsub.f32 %v29_v0, %v49_v10  ;;  %v55_v13 = vsub.f32 %v31_v1, %v51_v11 }
  0xa6   :  { %v41_v14 = vpop.xlane.xlu0 %40  ;;  %v47_v15 = vpop.xlane.xlu1 %46 }
  0xa7   :  { %v50_v16 = vmul.f32 0.03125, %v41_v14  ;;  %v52_v17 = vmul.f32 0.03125, %v47_v15  ;;  %v57_v18 = vmul.f32 %v53_v12, %v53_v12  ;;  %v59_v19 = vmul.f32 %v55_v13, %v55_v13 }
  0xa9   :  { %v54_v20 = vsub.f32 %v30_v2, %v50_v16  ;;  %v56_v21 = vsub.f32 %v32_v5, %v52_v17  ;;  %v61_v22 = vsel %vm35_vm0, %v57_v18, 0.0  ;;  %v67_v23 = vsel %vm35_vm0, %v59_v19, 0.0 }
  0xaa   :  { %62 = vadd.xlane.f32.xlu0 %v61_v22 }
  0xab   :  { %v58_v24 = vmul.f32 %v54_v20, %v54_v20  ;;  %v60_v25 = vmul.f32 %v56_v21, %v56_v21 }
  0xad   :  { %v64_v26 = vsel %vm35_vm0, %v58_v24, 0.0  ;;  %v70_v27 = vsel %vm35_vm0, %v60_v25, 0.0 }
  0xae   :  { %68 = vadd.xlane.f32.xlu0 %v67_v23  ;;  %65 = vadd.xlane.f32.xlu1 %v64_v26 }
  0xb2   :  { %71 = vadd.xlane.f32.xlu1 %v70_v27 }
 0x137   :  { %v63_v28 = vpop.xlane.xlu0 %62 }
 0x138   :  { %v73_v29 = vmul.f32 0.03125, %v63_v28 }
 0x13a   :  { %v77_v30 = vadd.f32 1e-12, %v73_v29 }
 0x13b   :  { %v66_v31 = vpop.xlane.xlu1 %65  ;;  %v69_v32 = vpop.xlane.xlu0 %68 }
 0x13c   :  { %136 = vrsqrt.f32 %v77_v30  ;;  %v74_v33 = vmul.f32 0.03125, %v66_v31  ;;  %v75_v34 = vmul.f32 0.03125, %v69_v32 }
 0x13e   :  { %v78_v35 = vadd.f32 1e-12, %v74_v33  ;;  %v79_v36 = vadd.f32 1e-12, %v75_v34 }
 0x13f   :  { %v72_v37 = vpop.xlane.xlu1 %71 }
 0x140   :  { %138 = vrsqrt.f32 %v78_v35  ;;  %v76_v38 = vmul.f32 0.03125, %v72_v37 }
 0x141   :  { %140 = vrsqrt.f32 %v79_v36 }
 0x142   :  { %v80_v39 = vadd.f32 1e-12, %v76_v38 }
 0x144   :  { %142 = vrsqrt.f32 %v80_v39 }
 0x146   :  { %v137_v40 = vpop.eup %136 }
 0x147   :  { %v85_v42 = vmul.f32 %v137_v40, %v53_v12 }
 0x149   :  { %v95_v44 = vmul.f32 %v130_v41, %v85_v42 }
 0x14a   :  { %v139_v45 = vpop.eup %138 }
 0x14b   :  { %v141_v46 = vpop.eup %140  ;;  %v86_v47 = vmul.f32 %v139_v45, %v54_v20  ;;  %v105_v48 = vadd.f32 %v131_v43, %v95_v44 }
 0x14c   :  { %v87_v49 = vmul.f32 %v141_v46, %v55_v13 }
 0x14d   :  { %v96_v50 = vmul.f32 %v130_v41, %v86_v47  ;;  %109 = vst.msk [vmem:[#allocation5] sm:$0xff] %vm35_vm0, %v105_v48 }
 0x14e   :  { %v143_v51 = vpop.eup %142  ;;  %v97_v52 = vmul.f32 %v130_v41, %v87_v49 }
 0x14f   :  { %v88_v53 = vmul.f32 %v143_v51, %v56_v21  ;;  %v106_v54 = vadd.f32 %v131_v43, %v96_v50 }
 0x150   :  { %v107_v55 = vadd.f32 %v131_v43, %v97_v52 }
 0x151   :  { %v98_v56 = vmul.f32 %v130_v41, %v88_v53  ;;  %110 = vst.msk [vmem:[#allocation5 + $0x8] sm:$0xff] %vm35_vm0, %v106_v54 }
 0x152   :  { %111 = vst.msk [vmem:[#allocation5 + $0x10] sm:$0xff] %vm35_vm0, %v107_v55 }
 0x153   :  { %v108_v57 = vadd.f32 %v131_v43, %v98_v56 }
 0x155   :  { %112 = vst.msk [vmem:[#allocation5 + $0x18] sm:$0xff] %vm35_vm0, %v108_v57 }
 0x156   :  { %177 = shalt.err (!%p174_p12)
}
 0x157   :  { %s178_s5 = scalar_lea.hbm %s267_s3, 512 }
 0x158   :  { %p179_p13 = scmp.ne.s32.totalorder %s267_s3, %s178_s5  ;;  %p182_p0 = scmp.lt.u32.totalorder %s178_s5, %s267_s3 }
 0x15a   :  { %p184_p1 = pnand %p182_p0, %p179_p13 }
 0x15c   :  { %187 = shalt.err (!%p184_p1)
}
 0x15d   :  { %124 = dma.vmem_to_hbm [thread:$0]  %s119_s29, 512, %s267_s3, [#allocation4], %s193_s22, %s193_s22, %s194_s23  }
 0x15e   :  { %190 = dma.done.wait [#allocation4], 512  }
 0x15f   :  { %191 = vsyncadd [#allocation4], 4294966784 }
 0x160   :  { %128 = vsyncpa [#allocation3], 1 }
 0x161   :  { %129 = vsyncpa [#allocation4], 1 }

</bundles_post_ra>
